<compile_context>
chip_gen: v6e
topology: v6e:2x2x1
jax: 0.10.0
libtpu: 0.0.40
codegen_flags: <defaults>
</compile_context>

<pallas_src>
import jax
import jax.numpy as jnp
from jax.experimental import pallas as pl
from jax.experimental.pallas import tpu as pltpu


def _round_up(x, m):
    return ((x + m - 1) // m) * m


def _choose_tb(B):
    """Batch tile: 8-row aligned, capped at 2048, >=4 grid steps when large."""
    if B <= 8:
        return B                      # block dim == full array dim (legal)
    tb = _round_up(pl.cdiv(B, 4), 8)  # >=4 steps -> both TCs used on v7x
    return int(max(8, min(2048, tb)))


def _mlp_kernel(x_ref,
                w1_ref, b1_ref,
                w2_ref, b2_ref,
                w3_ref, b3_ref,
                w4_ref, b4_ref,
                out_ref):
    # One (TB, 204) batch tile per grid step; bf16 weights stay resident in VMEM.
    x = x_ref[...].astype(jnp.bfloat16)

    h = jnp.dot(x, w1_ref[...], preferred_element_type=jnp.float32) + b1_ref[...]
    h = jnp.maximum(h, 0.0)                      # ReLU; Dropout(0.5) == id in eval

    h = jnp.dot(h.astype(jnp.bfloat16), w2_ref[...],
                preferred_element_type=jnp.float32) + b2_ref[...]
    h = jnp.maximum(h, 0.0)                      # ReLU; Dropout(0.3) == id in eval

    h = jnp.dot(h.astype(jnp.bfloat16), w3_ref[...],
                preferred_element_type=jnp.float32) + b3_ref[...]
    h = jnp.maximum(h, 0.0)                      # ReLU; Dropout(0.2) == id in eval

    logits = jnp.dot(h.astype(jnp.bfloat16), w4_ref[...],
                     preferred_element_type=jnp.float32) + b4_ref[...]
    out_ref[...] = logits.astype(out_ref.dtype)


def prepare_params(params):
    """One-time param prep (hoisted out of the per-call hot path):
    weights (in,out) -> bf16 MXU operands, biases (1,out) kept f32."""
    prepped = {}
    for i in range(1, 5):
        prepped[f"w{i}"] = params[f"w{i}"].astype(jnp.bfloat16)
        prepped[f"b{i}"] = params[f"b{i}"].astype(jnp.float32)
    return prepped


def pose_classifier_forward(x, prepped):
    """x: (B, 51, 4) float32.  prepped: output of prepare_params()."""
    B = x.shape[0]
    x2d = x.reshape(B, -1)                        # nn.Flatten -> (B, 204), f32
    f_in = x2d.shape[1]
    num_classes = prepped["w4"].shape[1]

    TB = _choose_tb(B)
    grid = (pl.cdiv(B, TB),)

    weights = (prepped["w1"], prepped["b1"],
               prepped["w2"], prepped["b2"],
               prepped["w3"], prepped["b3"],
               prepped["w4"], prepped["b4"])

    # Resident blocks: constant block index -> fetched once, reused every step.
    weight_specs = [pl.BlockSpec(w.shape, lambda i: (0, 0)) for w in weights]

    h1, h2, h3 = 256, 128, 64
    flops = 2 * B * (f_in * h1 + h1 * h2 + h2 * h3 + h3 * num_classes)
    bytes_accessed = (x2d.size * 4
                      + sum(int(w.size) * w.dtype.itemsize for w in weights)
                      + B * num_classes * 4)
    cost = pl.CostEstimate(flops=flops, transcendentals=0,
                           bytes_accessed=bytes_accessed)

    out = pl.pallas_call(
        _mlp_kernel,
        out_shape=jax.ShapeDtypeStruct((B, num_classes), jnp.float32),
        grid=grid,
        in_specs=[pl.BlockSpec((TB, f_in), lambda i: (i, 0))] + weight_specs,
        out_specs=pl.BlockSpec((TB, num_classes), lambda i: (i, 0)),
        compiler_params=pltpu.CompilerParams(
            dimension_semantics=("parallel",)),
        cost_estimate=cost,
    )(x2d, *weights)

    return out


def init_params(key, num_classes=3):
    """Deterministic init mimicking nn.Linear default (uniform +- 1/sqrt(fan_in))."""
    dims = [(51 * 4, 256), (256, 128), (128, 64), (64, num_classes)]
    params = {}
    for idx, (fan_in, fan_out) in enumerate(dims, start=1):
        key, kw, kb = jax.random.split(key, 3)
        bound = 1.0 / (fan_in ** 0.5)
        # stored as (in, out) so the kernel computes x @ W
        params[f"w{idx}"] = jax.random.uniform(
            kw, (fan_in, fan_out), jnp.float32, minval=-bound, maxval=bound)
        params[f"b{idx}"] = jax.random.uniform(
            kb, (1, fan_out), jnp.float32, minval=-bound, maxval=bound)
    return params


def _reference_f32(x, params):
    B = x.shape[0]
    h = x.reshape(B, -1)
    h = jnp.maximum(h @ params["w1"] + params["b1"], 0.0)
    h = jnp.maximum(h @ params["w2"] + params["b2"], 0.0)
    h = jnp.maximum(h @ params["w3"] + params["b3"], 0.0)
    return h @ params["w4"] + params["b4"]


def _reference_bf16(x, params):
    """Same bf16-operand / f32-accumulate semantics as the kernel."""
    B = x.shape[0]
    h = x.reshape(B, -1)

    def lin(h, w, b):
        return jnp.dot(h.astype(jnp.bfloat16), w.astype(jnp.bfloat16),
                       preferred_element_type=jnp.float32) + b

    h = jnp.maximum(lin(h, params["w1"], params["b1"]), 0.0)
    h = jnp.maximum(lin(h, params["w2"], params["b2"]), 0.0)
    h = jnp.maximum(lin(h, params["w3"], params["b3"]), 0.0)
    return lin(h, params["w4"], params["b4"])


if __name__ == "__main__":
    key = jax.random.PRNGKey(0)
    key, kx, kp, kx2 = jax.random.split(key, 4)

    params = init_params(kp, num_classes=3)
    prepped = prepare_params(params)              # one-time bf16 weight prep

    # Small batch (matches the module's typical usage).
    B = 2
    x = jax.random.normal(kx, (B, 51, 4), dtype=jnp.float32)
    logits = pose_classifier_forward(x, prepped)
    jax.block_until_ready(logits)
    assert logits.shape == (B, 3) and logits.dtype == jnp.float32
    assert jnp.allclose(logits, _reference_bf16(x, params), atol=1e-3, rtol=1e-3)
    assert jnp.allclose(logits, _reference_f32(x, params), atol=5e-2, rtol=5e-2)

    # Larger batch exercising the batch grid (multiple tiles + ragged tail block).
    B2 = 1030
    x2 = jax.random.normal(kx2, (B2, 51, 4), dtype=jnp.float32)
    logits2 = pose_classifier_forward(x2, prepped)
    jax.block_until_ready(logits2)
    assert logits2.shape == (B2, 3)
    assert jnp.allclose(logits2, _reference_bf16(x2, params), atol=1e-3, rtol=1e-3)
    assert jnp.allclose(logits2, _reference_f32(x2, params), atol=5e-2, rtol=5e-2)

    print("KERNEL_OK")
</pallas_src>

<mosaic_0001>
module attributes {stable_mosaic.version = 11 : i64} {
  func.func @_mlp_kernel(%arg0: i32, %arg1: memref<2x204xf32, #tpu.memory_space<vmem>>, %arg2: memref<204x256xbf16, #tpu.memory_space<vmem>>, %arg3: memref<1x256xf32, #tpu.memory_space<vmem>>, %arg4: memref<256x128xbf16, #tpu.memory_space<vmem>>, %arg5: memref<1x128xf32, #tpu.memory_space<vmem>>, %arg6: memref<128x64xbf16, #tpu.memory_space<vmem>>, %arg7: memref<1x64xf32, #tpu.memory_space<vmem>>, %arg8: memref<64x3xbf16, #tpu.memory_space<vmem>>, %arg9: memref<1x3xf32, #tpu.memory_space<vmem>>, %arg10: memref<2x3xf32, #tpu.memory_space<vmem>>) attributes {dimension_semantics = [#tpu.dimension_semantics<parallel>], iteration_bounds = array<i64: 1>, scalar_prefetch = 0 : i64, scratch_operands = 0 : i64, tpu.core_type = #tpu.core_type<tc>, window_params = [{transform_indices = @transform_0, window_bounds = array<i64: 2, 204>}, {pipeline_mode = #tpu.pipeline_mode<synchronous>, transform_indices = @transform_1, window_bounds = array<i64: 204, 256>}, {pipeline_mode = #tpu.pipeline_mode<synchronous>, transform_indices = @transform_2, window_bounds = array<i64: 1, 256>}, {pipeline_mode = #tpu.pipeline_mode<synchronous>, transform_indices = @transform_3, window_bounds = array<i64: 256, 128>}, {pipeline_mode = #tpu.pipeline_mode<synchronous>, transform_indices = @transform_4, window_bounds = array<i64: 1, 128>}, {pipeline_mode = #tpu.pipeline_mode<synchronous>, transform_indices = @transform_5, window_bounds = array<i64: 128, 64>}, {pipeline_mode = #tpu.pipeline_mode<synchronous>, transform_indices = @transform_6, window_bounds = array<i64: 1, 64>}, {pipeline_mode = #tpu.pipeline_mode<synchronous>, transform_indices = @transform_7, window_bounds = array<i64: 64, 3>}, {pipeline_mode = #tpu.pipeline_mode<synchronous>, transform_indices = @transform_8, window_bounds = array<i64: 1, 3>}, {transform_indices = @transform_9, window_bounds = array<i64: 2, 3>}]} {
    %c0 = arith.constant 0 : index
    %c0_0 = arith.constant 0 : index
    %0 = vector.load %arg1[%c0, %c0_0] : memref<2x204xf32, #tpu.memory_space<vmem>>, vector<2x204xf32>
    %1 = arith.truncf %0 : vector<2x204xf32> to vector<2x204xbf16>
    %c0_1 = arith.constant 0 : index
    %c0_2 = arith.constant 0 : index
    %2 = vector.load %arg2[%c0_1, %c0_2] : memref<204x256xbf16, #tpu.memory_space<vmem>>, vector<204x256xbf16>
    %cst = arith.constant dense<0.000000e+00> : vector<2x256xf32>
    %3 = tpu.matmul %1, %2, %cst {dimension_numbers = #tpu.dot_dimension_numbers<[1], [0], [0], [1], [0, 0, 1, 1], [], []>} : vector<2x204xbf16>, vector<204x256xbf16>, vector<2x256xf32> -> vector<2x256xf32>
    %c0_3 = arith.constant 0 : index
    %c0_4 = arith.constant 0 : index
    %4 = vector.load %arg3[%c0_3, %c0_4] : memref<1x256xf32, #tpu.memory_space<vmem>>, vector<1x256xf32>
    %5 = vector.broadcast %4 : vector<1x256xf32> to vector<2x256xf32>
    %6 = arith.addf %3, %5 : vector<2x256xf32>
    %cst_5 = arith.constant 0.000000e+00 : f32
    %7 = vector.broadcast %cst_5 : f32 to vector<2x256xf32>
    %8 = arith.maximumf %6, %7 : vector<2x256xf32>
    %9 = arith.truncf %8 : vector<2x256xf32> to vector<2x256xbf16>
    %c0_6 = arith.constant 0 : index
    %c0_7 = arith.constant 0 : index
    %10 = vector.load %arg4[%c0_6, %c0_7] : memref<256x128xbf16, #tpu.memory_space<vmem>>, vector<256x128xbf16>
    %cst_8 = arith.constant dense<0.000000e+00> : vector<2x128xf32>
    %11 = tpu.matmul %9, %10, %cst_8 {dimension_numbers = #tpu.dot_dimension_numbers<[1], [0], [0], [1], [0, 0, 1, 1], [], []>} : vector<2x256xbf16>, vector<256x128xbf16>, vector<2x128xf32> -> vector<2x128xf32>
    %c0_9 = arith.constant 0 : index
    %c0_10 = arith.constant 0 : index
    %12 = vector.load %arg5[%c0_9, %c0_10] : memref<1x128xf32, #tpu.memory_space<vmem>>, vector<1x128xf32>
    %13 = vector.broadcast %12 : vector<1x128xf32> to vector<2x128xf32>
    %14 = arith.addf %11, %13 : vector<2x128xf32>
    %cst_11 = arith.constant 0.000000e+00 : f32
    %15 = vector.broadcast %cst_11 : f32 to vector<2x128xf32>
    %16 = arith.maximumf %14, %15 : vector<2x128xf32>
    %17 = arith.truncf %16 : vector<2x128xf32> to vector<2x128xbf16>
    %c0_12 = arith.constant 0 : index
    %c0_13 = arith.constant 0 : index
    %18 = vector.load %arg6[%c0_12, %c0_13] : memref<128x64xbf16, #tpu.memory_space<vmem>>, vector<128x64xbf16>
    %cst_14 = arith.constant dense<0.000000e+00> : vector<2x64xf32>
    %19 = tpu.matmul %17, %18, %cst_14 {dimension_numbers = #tpu.dot_dimension_numbers<[1], [0], [0], [1], [0, 0, 1, 1], [], []>} : vector<2x128xbf16>, vector<128x64xbf16>, vector<2x64xf32> -> vector<2x64xf32>
    %c0_15 = arith.constant 0 : index
    %c0_16 = arith.constant 0 : index
    %20 = vector.load %arg7[%c0_15, %c0_16] : memref<1x64xf32, #tpu.memory_space<vmem>>, vector<1x64xf32>
    %21 = vector.broadcast %20 : vector<1x64xf32> to vector<2x64xf32>
    %22 = arith.addf %19, %21 : vector<2x64xf32>
    %cst_17 = arith.constant 0.000000e+00 : f32
    %23 = vector.broadcast %cst_17 : f32 to vector<2x64xf32>
    %24 = arith.maximumf %22, %23 : vector<2x64xf32>
    %25 = arith.truncf %24 : vector<2x64xf32> to vector<2x64xbf16>
    %c0_18 = arith.constant 0 : index
    %c0_19 = arith.constant 0 : index
    %26 = vector.load %arg8[%c0_18, %c0_19] : memref<64x3xbf16, #tpu.memory_space<vmem>>, vector<64x3xbf16>
    %cst_20 = arith.constant dense<0.000000e+00> : vector<2x3xf32>
    %27 = tpu.matmul %25, %26, %cst_20 {dimension_numbers = #tpu.dot_dimension_numbers<[1], [0], [0], [1], [0, 0, 1, 1], [], []>} : vector<2x64xbf16>, vector<64x3xbf16>, vector<2x3xf32> -> vector<2x3xf32>
    %c0_21 = arith.constant 0 : index
    %c0_22 = arith.constant 0 : index
    %28 = vector.load %arg9[%c0_21, %c0_22] : memref<1x3xf32, #tpu.memory_space<vmem>>, vector<1x3xf32>
    %29 = vector.broadcast %28 : vector<1x3xf32> to vector<2x3xf32>
    %30 = arith.addf %27, %29 : vector<2x3xf32>
    %c0_23 = arith.constant 0 : index
    %c0_24 = arith.constant 0 : index
    %31 = vector.load %arg10[%c0_23, %c0_24] : memref<2x3xf32, #tpu.memory_space<vmem>>, vector<2x3xf32>
    tpu.vector_store %arg10[%c0_23, %c0_24], %30 {strides = array<i32>} : memref<2x3xf32, #tpu.memory_space<vmem>>, vector<2x3xf32>,
    return
  }
  func.func @transform_0(%arg0: i32) -> (i32, i32) {
    %c0_i32 = arith.constant 0 : i32
    %c0_i32_0 = arith.constant 0 : i32
    return %arg0, %c0_i32 : i32, i32
  }
  func.func @transform_1(%arg0: i32) -> (i32, i32) {
    %c0_i32 = arith.constant 0 : i32
    %c0_i32_0 = arith.constant 0 : i32
    %c0_i32_1 = arith.constant 0 : i32
    return %c0_i32, %c0_i32_0 : i32, i32
  }
  func.func @transform_2(%arg0: i32) -> (i32, i32) {
    %c0_i32 = arith.constant 0 : i32
    %c0_i32_0 = arith.constant 0 : i32
    %c0_i32_1 = arith.constant 0 : i32
    return %c0_i32, %c0_i32_0 : i32, i32
  }
  func.func @transform_3(%arg0: i32) -> (i32, i32) {
    %c0_i32 = arith.constant 0 : i32
    %c0_i32_0 = arith.constant 0 : i32
    %c0_i32_1 = arith.constant 0 : i32
    return %c0_i32, %c0_i32_0 : i32, i32
  }
  func.func @transform_4(%arg0: i32) -> (i32, i32) {
    %c0_i32 = arith.constant 0 : i32
    %c0_i32_0 = arith.constant 0 : i32
    %c0_i32_1 = arith.constant 0 : i32
    return %c0_i32, %c0_i32_0 : i32, i32
  }
  func.func @transform_5(%arg0: i32) -> (i32, i32) {
    %c0_i32 = arith.constant 0 : i32
    %c0_i32_0 = arith.constant 0 : i32
    %c0_i32_1 = arith.constant 0 : i32
    return %c0_i32, %c0_i32_0 : i32, i32
  }
  func.func @transform_6(%arg0: i32) -> (i32, i32) {
    %c0_i32 = arith.constant 0 : i32
    %c0_i32_0 = arith.constant 0 : i32
    %c0_i32_1 = arith.constant 0 : i32
    return %c0_i32, %c0_i32_0 : i32, i32
  }
  func.func @transform_7(%arg0: i32) -> (i32, i32) {
    %c0_i32 = arith.constant 0 : i32
    %c0_i32_0 = arith.constant 0 : i32
    %c0_i32_1 = arith.constant 0 : i32
    return %c0_i32, %c0_i32_0 : i32, i32
  }
  func.func @transform_8(%arg0: i32) -> (i32, i32) {
    %c0_i32 = arith.constant 0 : i32
    %c0_i32_0 = arith.constant 0 : i32
    %c0_i32_1 = arith.constant 0 : i32
    return %c0_i32, %c0_i32_0 : i32, i32
  }
  func.func @transform_9(%arg0: i32) -> (i32, i32) {
    %c0_i32 = arith.constant 0 : i32
    %c0_i32_0 = arith.constant 0 : i32
    return %arg0, %c0_i32 : i32, i32
  }
}

</mosaic_0001>

<bundles_post_ra>
// kernel: tpu_custom_call.1
= control target key start
LH: loop header
LB: loop body
LE: loop exit
PB: predicated region body
PF: predicated region fallthrough
CT: control target
= control target key end

     0   :  { %14 = vsyncpa [#allocation3], 0  ;;  %s1101_s0 = inlined_call_operand.vmem [shape: f32[2,204], index: 0, kind: input, shape index: {}]   ;;  %s1102_s1 = inlined_call_operand.hbm [shape: bf16[204,256], index: 1, kind: input, shape index: {}]   ;;  %s1103_s2 = inlined_call_operand.vmem [shape: f32[1,256], index: 2, kind: input, shape index: {}]   ;;  %s1104_s3 = inlined_call_operand.vmem [shape: bf16[256,128], index: 3, kind: input, shape index: {}]   ;;  %s1105_s4 = inlined_call_operand.vmem [shape: f32[1,128], index: 4, kind: input, shape index: {}]   ;;  %s1106_s5 = inlined_call_operand.vmem [shape: bf16[128,64], index: 5, kind: input, shape index: {}]   ;;  %s1107_s6 = inlined_call_operand.vmem [shape: f32[1,64], index: 6, kind: input, shape index: {}]   ;;  %s1108_s7 = inlined_call_operand.vmem [shape: bf16[64,3], index: 7, kind: input, shape index: {}]   ;;  %s1109_s8 = inlined_call_operand.vmem [shape: f32[1,3], index: 8, kind: input, shape index: {}]   ;;  %s1110_s9 = inlined_call_operand.hbm [shape: f32[2,3], index: 9, kind: output, shape index: {}]  }
   0x1   :  { %15 = vsyncpa [#allocation4], 0  ;;  %s920_s30 = smov [#allocation2]  }
   0x2   :  { %s23_s10 = sshll.u32 %s920_s30, 4  ;;  %s24_s10 = int_to_ptr.vmem [resolvable:$true] %s23_s10 }
   0x3   :  { %s884_s11 = scalar_lea.vmem %s24_s10, 3328  ;;  %p889_p1 = scmp.lt.s32.totalorder %s24_s10, %s24_s10 }
   0x4   :  { %p885_p0 = scmp.ne.s32.totalorder %s24_s10, %s884_s11  ;;  %p890_p2 = scmp.lt.s32.totalorder %s884_s11, %s884_s11 }
   0x6   :  { %p891_p3 = por %p890_p2, %p889_p1 }
   0x8   :  { %p892_p4 = pnand %p891_p3, %p885_p0 }
   0xa   :  { %895 = shalt.err (!%p892_p4)
}
   0xb   :  { %s921_s12 = smov 128   ;;  %s922_s13 = smov 8  }
   0xc   :  { %29 = dma.hbm_to_vmem [thread:$0]  %s1102_s1, 3328, %s24_s10, [#allocation3], %s921_s12, %s921_s12, %s922_s13  }
   0xd   :  { %916 = dma.done.wait [#allocation3], 3328  }
   0xe   :  { %917 = vsyncadd [#allocation3], 4294963968  ;;  %v809_v0 = vld [vmem:[#allocation2 + $0x74] ss:$8 sps:$4 sm:$0xff]   ;;  %v811_v1 = vld [vmem:[#allocation2 + $0x70] ss:$8 sps:$4 sm:$0xff]   ;;  %v90_v48 = vlaneseq }
   0xf   :  { %239 = vmatprep.subr.bf16.mxu0 %v809_v0  ;;  %v812_v2 = vld [vmem:[#allocation2 + $0x64] ss:$8 sps:$4 sm:$0xff]   ;;  %v814_v3 = vld [vmem:[#allocation2 + $0x60] ss:$8 sps:$4 sm:$0xff]   ;;  %v815_v4 = vld [vmem:[#allocation2 + $0x54] ss:$8 sps:$4 sm:$0xff]  }
  0x10   :  { %240 = vmatpush1.bf16.msra.mxu0 %v811_v1  ;;  %v817_v5 = vld [vmem:[#allocation2 + $0x50] ss:$8 sps:$4 sm:$0xff]   ;;  %v818_v6 = vld [vmem:[#allocation2 + $0x44] ss:$8 sps:$4 sm:$0xff]   ;;  %v820_v7 = vld [vmem:[#allocation2 + $0x40] ss:$8 sps:$4 sm:$0xff]  }
  0x11   :  { %241 = vmatprep.subr.bf16.mxu0 %v812_v2  ;;  %v821_v8 = vld [vmem:[#allocation2 + $0x34] ss:$8 sps:$4 sm:$0xff]   ;;  %v823_v9 = vld [vmem:[#allocation2 + $0x30] ss:$8 sps:$4 sm:$0xff]   ;;  %v824_v10 = vld [vmem:[#allocation2 + $0x24] ss:$8 sps:$4 sm:$0xff]  }
  0x12   :  { %v826_v11 = vld [vmem:[#allocation2 + $0x20] ss:$8 sps:$4 sm:$0xff]   ;;  %v827_v13 = vld [vmem:[#allocation2 + $0x14] ss:$8 sps:$4 sm:$0xff]   ;;  %vm228_vm0 = vcmask 621568   ;;  %vm232_vm1 = vcmask 1045504  }
  0x13   :  { %v982_v12 = vld.sshfl [vmem:[%s1101_s0] sm:$0x33 pattern:$0x76325410]  ;;  %v848_v15 = vld [vmem:[%s1104_s3 + $0x78] sm:$0xff]   ;;  %v850_v18 = vld [vmem:[%s1104_s3 + $0x70] sm:$0xff]  }
  0x14   :  { %242 = vmatpush1.bf16.msra.mxu0 %v814_v3  ;;  %v57_v14 = vcombine.high %v982_v12, %v982_v12  ;;  %v849_v16 = vld [vmem:[%s1104_s3 + $0x38] sm:$0xff]   ;;  %735 = vmatprep.subr.bf16.mxu1 %v848_v15  ;;  %v851_v19 = vld [vmem:[%s1104_s3 + $0x30] sm:$0xff]   ;;  %v852_v20 = vld [vmem:[%s1104_s3 + $0x68] sm:$0xff]   ;;  %v60_v42 = vpack.c.bf16 %v982_v12, %v982_v12  ;;  %v923_v47 = vmov 0.0   ;;  %v91_v49 = vshrl.u32 %v90_v48, 7  ;;  %s925_s28 = smov [#allocation5]  }
  0x15   :  { %243 = vmatprep.subr.bf16.mxu0 %v815_v4  ;;  %736 = vmatpush3.bf16.msra.mxu1 %v849_v16  ;;  %v829_v21 = vld [vmem:[#allocation2 + $0x10] ss:$8 sps:$4 sm:$0xff]   ;;  %v830_v22 = vld [vmem:[#allocation2 + $0x4] ss:$8 sps:$4 sm:$0xff]   ;;  %v832_v27 = vld [vmem:[#allocation2] ss:$8 sps:$4 sm:$0xff]  }
  0x16   :  { %v61_v17 = vpack.c.bf16 %v57_v14, %v57_v14  ;;  %737 = vmatprep.subr.bf16.mxu1 %v850_v18  ;;  %v835_v23 = vld [vmem:[#allocation2 + $0xc0] ss:$8 sps:$4 sm:$0x3f]   ;;  %v833_v25 = vld [vmem:[#allocation2 + $0xc4] ss:$8 sps:$4 sm:$0x3f]  }
  0x17   :  { %v853_v24 = vld [vmem:[%s1104_s3 + $0x28] sm:$0xff]   ;;  %v854_v26 = vld [vmem:[%s1104_s3 + $0x60] sm:$0xff]   ;;  %v234_v29 = vsel %vm232_vm1, %v835_v23, 0  ;;  %v836_v30 = vld [vmem:[#allocation2 + $0xb4] ss:$8 sps:$4 sm:$0xff]   ;;  %v92_v50 = vsub.s32 0, %v91_v49 }
  0x18   :  { %244 = vmatpush1.bf16.msra.mxu0 %v817_v5  ;;  %702 = vmatprep.mubr.msk.bf16.mxu0 %vm228_vm0, %v61_v17  ;;  %v855_v28 = vld [vmem:[%s1104_s3 + $0x20] sm:$0xff]   ;;  %v856_v31 = vld [vmem:[%s1104_s3 + $0x58] sm:$0xff]   ;;  %v858_v33 = vld [vmem:[%s1104_s3 + $0x50] sm:$0xff]   ;;  %v96_v52 = vsub.s32 1, %v91_v49  ;;  %vm924_vm2 = vmmov 0   ;;  %vm613_vm3 = vcmask 523264  }
  0x19   :  { %245 = vmatprep.subr.bf16.mxu0 %v818_v6  ;;  %738 = vmatpush3.bf16.msra.mxu1 %v851_v19  ;;  %v857_v32 = vld [vmem:[%s1104_s3 + $0x18] sm:$0xff]   ;;  %v839_v35 = vld [vmem:[#allocation2 + $0xa4] ss:$8 sps:$4 sm:$0xff]   ;;  %v859_v36 = vld [vmem:[%s1104_s3 + $0x10] sm:$0xff]   ;;  %vm657_vm4 = vcmask 17408  }
  0x1a   :  { %739 = vmatprep.subr.bf16.mxu1 %v852_v20  ;;  %v838_v34 = vld [vmem:[#allocation2 + $0xb0] ss:$8 sps:$4 sm:$0xff]   ;;  %v841_v37 = vld [vmem:[#allocation2 + $0xa0] ss:$8 sps:$4 sm:$0xff]   ;;  %v842_v38 = vld [vmem:[#allocation2 + $0x94] ss:$8 sps:$4 sm:$0xff]  }
  0x1b   :  { %v844_v39 = vld [vmem:[#allocation2 + $0x90] ss:$8 sps:$4 sm:$0xff]   ;;  %v845_v40 = vld [vmem:[#allocation2 + $0x84] ss:$8 sps:$4 sm:$0xff]   ;;  %v847_v41 = vld [vmem:[#allocation2 + $0x80] ss:$8 sps:$4 sm:$0xff]  }
  0x1c   :  { %246 = vmatpush1.bf16.msra.mxu0 %v820_v7  ;;  %v860_v43 = vld [vmem:[%s1104_s3 + $0x48] sm:$0xff]   ;;  %v862_v45 = vld [vmem:[%s1104_s3 + $0x40] sm:$0xff]   ;;  %v864_v0 = vld [vmem:[%s1106_s5 + $0x38] sm:$0xff]  }
  0x1d   :  { %247 = vmatprep.subr.bf16.mxu0 %v821_v8  ;;  %740 = vmatpush3.bf16.msra.mxu1 %v853_v24  ;;  %v861_v44 = vld [vmem:[%s1104_s3 + $0x8] sm:$0xff]   ;;  %v863_v46 = vld [vmem:[%s1104_s3] sm:$0xff]   ;;  %v865_v2 = vld [vmem:[%s1106_s5 + $0x30] sm:$0xff]  }
  0x1e   :  { %741 = vmatprep.subr.bf16.mxu1 %v854_v26  ;;  %v88_v51 = vld [vmem:[%s1103_s2] sm:$0x3]  ;;  %v866_v3 = vld [vmem:[%s1106_s5 + $0x28] sm:$0xff]   ;;  %v868_v5 = vld [vmem:[%s1106_s5 + $0x18] sm:$0xff]  }
  0x1f   :  { %v93_v53 = vrot.slane %v88_v51, %v92_v50  ;;  %v97_v54 = vrot.slane %v88_v51, %v96_v52  ;;  %v867_v4 = vld [vmem:[%s1106_s5 + $0x20] sm:$0xff]   ;;  %v869_v6 = vld [vmem:[%s1106_s5 + $0x10] sm:$0xff]   ;;  %v870_v7 = vld [vmem:[%s1106_s5 + $0x8] sm:$0xff]  }
  0x20   :  { %248 = vmatpush1.bf16.msra.mxu0 %v823_v9  ;;  %v871_v8 = vld [vmem:[%s1106_s5] sm:$0xff]   ;;  %v872_v9 = vld [vmem:[%s1108_s7 + $0x18] sm:$0xff]   ;;  %v874_v20 = vld [vmem:[%s1108_s7 + $0x8] sm:$0xff]  }
  0x21   :  { %249 = vmatprep.subr.bf16.mxu0 %v824_v10  ;;  %742 = vmatpush3.bf16.msra.mxu1 %v855_v28  ;;  %v873_v10 = vld [vmem:[%s1108_s7 + $0x10] sm:$0xff]   ;;  %v703_v12 = vld [vmem:[%s1105_s4] ss:$0 sm:$0xff] }
  0x22   :  { %743 = vmatprep.subr.bf16.mxu1 %v856_v31 }
  0x24   :  { %250 = vmatpush1.bf16.msra.mxu0 %v826_v11 }
  0x25   :  { %251 = vmatprep.subr.bf16.mxu0 %v827_v13  ;;  %744 = vmatpush3.bf16.msra.mxu1 %v857_v32 }
  0x26   :  { %745 = vmatprep.subr.bf16.mxu1 %v858_v33 }
  0x28   :  { %252 = vmatpush1.bf16.msra.mxu0 %v829_v21  ;;  %v875_v21 = vld [vmem:[%s1108_s7] sm:$0xff]   ;;  %s665_s7 = sshll.u32 %s925_s28, 4  ;;  %s666_s7 = int_to_ptr.vmem [resolvable:$true] %s665_s7 }
  0x29   :  { %253 = vmatprep.subr.bf16.mxu0 %v830_v22  ;;  %746 = vmatpush3.bf16.msra.mxu1 %v859_v36  ;;  %v720_v22 = vld [vmem:[%s1107_s6] ss:$0 sm:$0xff]  ;;  %s896_s6 = scalar_lea.vmem %s666_s7, 32  ;;  %p901_p6 = scmp.lt.s32.totalorder %s666_s7, %s666_s7 }
  0x2a   :  { %747 = vmatprep.subr.bf16.mxu1 %v860_v43  ;;  %p897_p5 = scmp.ne.s32.totalorder %s666_s7, %s896_s6  ;;  %p902_p7 = scmp.lt.s32.totalorder %s896_s6, %s896_s6 }
  0x2c   :  { %254 = vmatpush1.bf16.msra.mxu0 %v832_v27  ;;  %p903_p8 = por %p902_p7, %p901_p6 }
  0x2d   :  { %701 = vmatprep.subr.msk.bf16.mxu0 %vm232_vm1, %v833_v25  ;;  %748 = vmatpush3.bf16.msra.mxu1 %v861_v44 }
  0x2e   :  { %749 = vmatprep.subr.bf16.mxu1 %v862_v45  ;;  %p904_p9 = pnand %p903_p8, %p897_p5 }
  0x30   :  { %262 = vmatpush2.bf16.msra.mxu0 %v234_v29 }
  0x31   :  { %263 = vmatprep.subr.bf16.mxu0 %v836_v30  ;;  %750 = vmatpush3.bf16.msra.mxu1 %v863_v46  ;;  %v729_v30 = vld [vmem:[%s1109_s8] ss:$0 sm:$0xff] }
  0x32   :  { %771 = vmatprep.subr.bf16.mxu1 %v923_v47 }
  0x34   :  { %264 = vmatpush2.bf16.msra.mxu0 %v838_v34 }
  0x35   :  { %265 = vmatprep.subr.bf16.mxu0 %v839_v35 }
  0x38   :  { %266 = vmatpush2.bf16.msra.mxu0 %v841_v37 }
  0x39   :  { %267 = vmatprep.subr.bf16.mxu0 %v842_v38 }
  0x3c   :  { %268 = vmatpush2.bf16.msra.mxu0 %v844_v39 }
  0x3d   :  { %269 = vmatprep.subr.bf16.mxu0 %v845_v40 }
  0x40   :  { %270 = vmatpush2.bf16.msra.mxu0 %v847_v41 }
  0x41   :  { %791 = vmatprep.subr.bf16.mxu0 %v923_v47 }
  0x43   :  { %272 = vmatmul.mubr.bf16.vlgmr.msra.gmra.mxu0 %v60_v42 }
  0x44   :  { %799 = vmatprep.mubr.msk.bf16.mxu0 %vm924_vm2, %v923_v47  ;;  %792 = vmatpush3.bf16.msra.mxu0 %v872_v9 }
  0x45   :  { %793 = vmatprep.subr.bf16.mxu0 %v923_v47 }
  0x48   :  { %794 = vmatpush3.bf16.msra.mxu0 %v873_v10 }
  0x49   :  { %795 = vmatprep.subr.bf16.mxu0 %v923_v47 }
  0x4c   :  { %796 = vmatpush3.bf16.msra.mxu0 %v874_v20 }
  0x4d   :  { %797 = vmatprep.subr.bf16.mxu0 %v923_v47 }
  0x50   :  { %798 = vmatpush3.bf16.msra.mxu0 %v875_v21 }
 0x103   :  { %v273_v55 = vpop.f32.mrf.mxu0 }
 0x104   :  { %v274_v56 = vadd.f32 %v273_v55, %v93_v53 }
 0x105   :  { %v275_v57 = vpop.f32.mrf.mxu0 }
 0x106   :  { %v276_v58 = vadd.f32 %v275_v57, %v97_v54  ;;  %v280_v59 = vmax.f32 %v274_v56, 0.0 }
 0x107   :  { %v277_v60 = vpop.f32.mrf.mxu0 }
 0x108   :  { %v281_v61 = vmax.f32 %v276_v58, 0.0  ;;  %v282_v1 = vpack.c.bf16 %v280_v59, %v280_v59 }
 0x109   :  { %v278_v62 = vpop.f32.mrf.mxu0 }
 0x10a   :  { %v283_v63 = vpack.c.bf16 %v281_v61, %v281_v61 }
 0x10c   :  { %451 = vmatprep.mubr.bf16.mxu1 %v283_v63 }
 0x10d   :  { %452 = vmatmul.mubr.bf16.vlgmr.msra.gmra.mxu1 %v282_v1 }
 0x10e   :  { %772 = vmatpush3.bf16.msra.mxu1 %v864_v0  ;;  %787 = vmatprep.mubr.msk.bf16.mxu1 %vm924_vm2, %v923_v47 }
 0x10f   :  { %773 = vmatprep.subr.bf16.mxu1 %v923_v47 }
 0x112   :  { %774 = vmatpush3.bf16.msra.mxu1 %v865_v2 }
 0x113   :  { %775 = vmatprep.subr.bf16.mxu1 %v923_v47 }
 0x116   :  { %776 = vmatpush3.bf16.msra.mxu1 %v866_v3 }
 0x117   :  { %777 = vmatprep.subr.bf16.mxu1 %v923_v47 }
 0x11a   :  { %778 = vmatpush3.bf16.msra.mxu1 %v867_v4 }
 0x11b   :  { %779 = vmatprep.subr.bf16.mxu1 %v923_v47 }
 0x11e   :  { %780 = vmatpush3.bf16.msra.mxu1 %v868_v5 }
 0x11f   :  { %781 = vmatprep.subr.bf16.mxu1 %v923_v47 }
 0x122   :  { %782 = vmatpush3.bf16.msra.mxu1 %v869_v6 }
 0x123   :  { %783 = vmatprep.subr.bf16.mxu1 %v923_v47 }
 0x126   :  { %784 = vmatpush3.bf16.msra.mxu1 %v870_v7 }
 0x127   :  { %785 = vmatprep.subr.bf16.mxu1 %v923_v47 }
 0x12a   :  { %786 = vmatpush3.bf16.msra.mxu1 %v871_v8 }
 0x1cd   :  { %v751_v11 = vpop.f32.mrf.mxu1 }
 0x1cf   :  { %v752_v13 = vpop.f32.mrf.mxu1 }
 0x1d0   :  { %v753_v14 = vadd.f32 %v752_v13, %v751_v11 }
 0x1d1   :  { %v754_v15 = vpop.f32.mrf.mxu1 }
 0x1d2   :  { %v454_v16 = vadd.f32 %v753_v14, %v703_v12 }
 0x1d3   :  { %v755_v17 = vpop.f32.mrf.mxu1 }
 0x1d4   :  { %v459_v18 = vmax.f32 %v454_v16, 0.0 }
 0x1d6   :  { %v460_v19 = vpack.c.bf16 %v459_v18, %v459_v18 }
 0x1d8   :  { %788 = vmatmul.mubr.bf16.vlgmr.msra.gmra.mxu1 %v460_v19 }
 0x298   :  { %v566_v23 = vpop.f32.mrf.mxu1 }
 0x299   :  { %v567_v24 = vadd.f32 %v720_v22, %v566_v23 }
 0x29a   :  { %v789_v25 = vpop.f32.mrf.mxu1 }
 0x29b   :  { %v572_v26 = vmax.f32 %v567_v24, 0.0 }
 0x29c   :  { %v569_v27 = vpop.f32.mrf.mxu1 }
 0x29d   :  { %v573_v28 = vpack.c.bf16 %v572_v26, %v572_v26 }
 0x29e   :  { %v790_v29 = vpop.f32.mrf.mxu1 }
 0x29f   :  { %800 = vmatmul.mubr.msk.bf16.vlgmr.msra.gmra.mxu0 %vm613_vm3, %v573_v28 }
 0x35f   :  { %v651_v31 = vpop.f32.mrf.mxu0 }
 0x360   :  { %v652_v32 = vadd.f32 %v729_v30, %v651_v31 }
 0x361   :  { %v801_v33 = vpop.f32.mrf.mxu0 }
 0x362   :  { %658 = vst.msk [vmem:[#allocation5] sm:$0x3] %vm657_vm4, %v652_v32 }
 0x363   :  { %v654_v34 = vpop.f32.mrf.mxu0 }
 0x364   :  { %907 = shalt.err (!%p904_p9)
}
 0x365   :  { %668 = dma.vmem_to_hbm [thread:$0]  %s666_s7, 32, %s1110_s9, [#allocation4]   ;;  %v802_v35 = vpop.f32.mrf.mxu0 }
 0x366   :  { %918 = dma.done.wait [#allocation4], 32  }
 0x367   :  { %919 = vsyncadd [#allocation4], 4294967264 }
 0x368   :  { %672 = vsyncpa [#allocation3], 1 }
 0x369   :  { %673 = vsyncpa [#allocation4], 1 }

</bundles_post_ra>
